<compile_context>
chip_gen: v6e
topology: v6e:2x2x1
jax: 0.10.0
libtpu: 0.0.40
codegen_flags: <defaults>
</compile_context>

<pallas_src>
import math
import functools

import jax
import jax.numpy as jnp
from jax.experimental import pallas as pl
from jax.experimental.pallas import tpu as pltpu


# -----------------------------------------------------------------------------
# Config (small, deterministic)
# -----------------------------------------------------------------------------
BATCH = 2
SEQ = 8
HIDDEN = 32
VOCAB = 64
N_LAYERS = 2
N_HEADS = 2
INTERMEDIATE = 64
HEAD_DIM = HIDDEN // N_HEADS

SPAN_MID = (2 * HIDDEN) // 2                    # MultiNonLinearClassifier mid dim = int(2H/2) = 32
P_PROJ = ((SPAN_MID + 4 + 127) // 128) * 128    # packed projection width (lane-dense) = 128 here

W_START, W_END, W_SPAN = 1.0, 1.0, 1.0          # loss weights


def _gelu(x):
    # tanh-approximation GELU (BERT-style); lowers cleanly on the TPU EUP/VPU.
    # TODO(synk): PyTorch nn.GELU defaults to the erf form; tanh approx drifts ~1e-3.
    c = math.sqrt(2.0 / math.pi)
    return 0.5 * x * (1.0 + jnp.tanh(c * (x + 0.044715 * x * x * x)))


# -----------------------------------------------------------------------------
# Pallas kernel: fused NER head
#   (start / end linear heads + pairwise span classifier Linear->GELU->Linear)
# Grid: (B, NQ)  — one sentence b, one q-tile of TQ query rows per step.
# -----------------------------------------------------------------------------
def ner_head_kernel(h_ref,      # (1, TQ, H)  bf16  q-tile of sequence_output
                    hT_ref,     # (1, H, S)   bf16  transposed sentence (j-side projection)
                    wp_ref,     # (H, P)      bf16  packed [W1_top | ws | we | 0]
                    bp_ref,     # (1, P)      f32   packed [b1     | bs | be | 0]
                    w1bT_ref,   # (M, H)      bf16  span W1 bottom half, transposed
                    w2_ref,     # (M, 1)      f32   span second-layer weight
                    b2_ref,     # (1, 1)      f32   span second-layer bias (SMEM scalar)
                    proj_ref,   # (1, TQ, P)  f32   out: packed projection (start/end in wrapper)
                    span_ref,   # (1, TQ, S)  f32   out: span logits, j lane-dense
                    *, M):
    h_tile = h_ref[0]                                                     # (TQ, H)
    hT = hT_ref[0]                                                        # (H, S)

    # One lane-dense MXU pass: a = h_i @ W1_top + b1, plus start/end heads.
    proj = jnp.dot(h_tile, wp_ref[...],
                   preferred_element_type=jnp.float32) + bp_ref[...]      # (TQ, P)
    proj_ref[0] = proj                                                    # single 128-lane store

    # cT[m, j] = (W1_bot^T h_j)[m]: m on sublanes, j on lanes (dense at S >= 128).
    cT = jnp.dot(w1bT_ref[...], hT, preferred_element_type=jnp.float32)   # (M, S)

    a = proj[:, :M]                                                       # (TQ, M), b1 folded in
    # z[i, m, j] = gelu(a[i, m] + cT[m, j]); m kept at TRUE width (no 128-lane padding).
    z = _gelu(a[:, :, None] + cT[None, :, :])                             # (TQ, M, S) f32
    # TODO(synk): dropout inside MultiNonLinearClassifier omitted (eval-mode identity).

    # m -> 1 contraction: VPU mul + sublane (XLU) reduce; output stays j-lane-dense.
    w2c = w2_ref[...][None, :, :]                                         # (1, M, 1)
    span_ref[0] = jnp.sum(z * w2c, axis=1) + b2_ref[0, 0]                 # (TQ, S)
    # TODO(synk): at production S, block the i axis with an unrolled lax.fori_loop so
    #             gelu(t+1) overlaps the contraction of block t and z stays small.


def ner_head(seq_out, hp, *, q_tile=None):
    """seq_out: (B, S, H) f32 -> start_logits (B,S,2), end_logits (B,S,2), span_logits (B,S,S)."""
    B, S, H = seq_out.shape
    M = hp["w2"].shape[0]
    P = hp["wp"].shape[1]
    TQ = S if q_tile is None else q_tile
    assert S % TQ == 0 and (TQ == S or TQ % 8 == 0)
    NQ = S // TQ

    # bf16 MXU operands, f32 accumulation; elementwise path stays f32 (v5e-safe).
    h_bf = seq_out.astype(jnp.bfloat16)
    hT_bf = jnp.swapaxes(h_bf, 1, 2)                                      # (B, H, S)
    wp_bf = hp["wp"].astype(jnp.bfloat16)
    w1bT_bf = hp["w1bT"].astype(jnp.bfloat16)

    kernel = functools.partial(ner_head_kernel, M=M)

    grid_spec = pltpu.PrefetchScalarGridSpec(
        num_scalar_prefetch=0,
        grid=(B, NQ),                       # >= 2 independent steps -> both v7x TCs busy
        in_specs=[
            pl.BlockSpec((1, TQ, H), lambda b, q: (b, q, 0)),
            pl.BlockSpec((1, H, S), lambda b, q: (b, 0, 0)),
            pl.BlockSpec((H, P), lambda b, q: (0, 0)),
            pl.BlockSpec((1, P), lambda b, q: (0, 0)),
            pl.BlockSpec((M, H), lambda b, q: (0, 0)),
            pl.BlockSpec((M, 1), lambda b, q: (0, 0)),
            pl.BlockSpec(memory_space=pltpu.MemorySpace.SMEM),            # b2 scalar
        ],
        out_specs=[
            pl.BlockSpec((1, TQ, P), lambda b, q: (b, q, 0)),
            pl.BlockSpec((1, TQ, S), lambda b, q: (b, q, 0)),
        ],
    )
    out_shape = (
        jax.ShapeDtypeStruct((B, S, P), jnp.float32),
        jax.ShapeDtypeStruct((B, S, S), jnp.float32),
    )

    # Explicit VMEM budget (z + double-buffered I/O tiles); important on v7x (64 MiB).
    z_bytes = TQ * M * S * 4
    io_bytes = 2 * (TQ * H * 2 + H * S * 2 + H * P * 2 + P * 4 + M * H * 2 + M * 4
                    + TQ * P * 4 + TQ * S * 4)
    vmem_limit = int(min(max(4 * z_bytes + 2 * io_bytes, 4 << 20), 96 << 20))

    # Advisory cost estimate so XLA schedules the plain-JAX mini-BERT around this call.
    flops = B * NQ * (2 * TQ * H * P + 2 * M * H * S + 10 * TQ * M * S)
    bytes_accessed = (2 * (B * S * H * 2) + 2 * (H * P + M * H) + 4 * (P + M + 1)
                      + 4 * (B * S * P + B * S * S))
    cost = pl.CostEstimate(flops=flops,
                           transcendentals=B * NQ * TQ * M * S,
                           bytes_accessed=bytes_accessed)

    proj, span_logits = pl.pallas_call(
        kernel,
        out_shape=out_shape,
        grid_spec=grid_spec,
        compiler_params=pltpu.CompilerParams(
            dimension_semantics=("parallel", "parallel"),
            vmem_limit_bytes=vmem_limit),
        cost_estimate=cost,
    )(h_bf, hT_bf, wp_bf, hp["bp"], w1bT_bf, hp["w2"], hp["b2"])

    start_logits = proj[..., M:M + 2]
    end_logits = proj[..., M + 2:M + 4]
    return start_logits, end_logits, span_logits


# -----------------------------------------------------------------------------
# Mini BERT backbone (plain-JAX glue; stands in for BertModel.from_pretrained)
# TODO(synk): the pretrained BERT encoder itself stays in plain JAX; only its
#             output feeds the Pallas NER-head kernel.
# -----------------------------------------------------------------------------
def layer_norm(x, g, b, eps=1e-12):
    mu = x.mean(-1, keepdims=True)
    var = ((x - mu) ** 2).mean(-1, keepdims=True)
    return (x - mu) / jnp.sqrt(var + eps) * g + b


def bert_forward(p, input_ids, token_type_ids, attention_mask):
    B, S = input_ids.shape
    x = (p["word_emb"][input_ids]
         + p["pos_emb"][jnp.arange(S)][None, :, :]
         + p["type_emb"][token_type_ids])
    x = layer_norm(x, p["emb_ln_g"], p["emb_ln_b"])
    ext_mask = (1.0 - attention_mask[:, None, None, :].astype(jnp.float32)) * -10000.0

    for lp in p["layers"]:
        q = x @ lp["wq"] + lp["bq"]
        k = x @ lp["wk"] + lp["bk"]
        v = x @ lp["wv"] + lp["bv"]

        def split_heads(t):
            return t.reshape(B, S, N_HEADS, HEAD_DIM).transpose(0, 2, 1, 3)

        qh, kh, vh = split_heads(q), split_heads(k), split_heads(v)
        att = jnp.einsum("bhqd,bhkd->bhqk", qh, kh) / math.sqrt(HEAD_DIM) + ext_mask
        att = jax.nn.softmax(att, axis=-1)
        ctx = jnp.einsum("bhqk,bhkd->bhqd", att, vh).transpose(0, 2, 1, 3).reshape(B, S, HIDDEN)
        x = layer_norm(x + ctx @ lp["wo"] + lp["bo"], lp["ln1_g"], lp["ln1_b"])
        ff = _gelu(x @ lp["wi"] + lp["bi"]) @ lp["wf"] + lp["bf"]
        x = layer_norm(x + ff, lp["ln2_g"], lp["ln2_b"])

    pooled = jnp.tanh(x[:, 0, :] @ p["pool_w"] + p["pool_b"])
    return x, pooled


# -----------------------------------------------------------------------------
# Parameter init (deterministic, synthetic) — head stored pre-packed / pre-transposed
# -----------------------------------------------------------------------------
def init_params(key):
    keys = iter(jax.random.split(key, 64))
    n = lambda shape, s=0.02: (jax.random.normal(next(keys), shape, jnp.float32) * s)

    bert = {
        "word_emb": n((VOCAB, HIDDEN)),
        "pos_emb": n((SEQ, HIDDEN)),
        "type_emb": n((2, HIDDEN)),
        "emb_ln_g": jnp.ones((HIDDEN,), jnp.float32),
        "emb_ln_b": jnp.zeros((HIDDEN,), jnp.float32),
        "pool_w": n((HIDDEN, HIDDEN)),
        "pool_b": jnp.zeros((HIDDEN,), jnp.float32),
        "layers": [],
    }
    for _ in range(N_LAYERS):
        bert["layers"].append({
            "wq": n((HIDDEN, HIDDEN)), "bq": jnp.zeros((HIDDEN,), jnp.float32),
            "wk": n((HIDDEN, HIDDEN)), "bk": jnp.zeros((HIDDEN,), jnp.float32),
            "wv": n((HIDDEN, HIDDEN)), "bv": jnp.zeros((HIDDEN,), jnp.float32),
            "wo": n((HIDDEN, HIDDEN)), "bo": jnp.zeros((HIDDEN,), jnp.float32),
            "ln1_g": jnp.ones((HIDDEN,), jnp.float32), "ln1_b": jnp.zeros((HIDDEN,), jnp.float32),
            "wi": n((HIDDEN, INTERMEDIATE)), "bi": jnp.zeros((INTERMEDIATE,), jnp.float32),
            "wf": n((INTERMEDIATE, HIDDEN)), "bf": jnp.zeros((HIDDEN,), jnp.float32),
            "ln2_g": jnp.ones((HIDDEN,), jnp.float32), "ln2_b": jnp.zeros((HIDDEN,), jnp.float32),
        })

    # ---- NER head: logical params ----
    ws = n((HIDDEN, 2)); bs = jnp.zeros((2,), jnp.float32)        # start_outputs
    we = n((HIDDEN, 2)); be = jnp.zeros((2,), jnp.float32)        # end_outputs
    w1a = n((HIDDEN, SPAN_MID))                                   # span W1 top half  (acts on h_i)
    w1b = n((HIDDEN, SPAN_MID))                                   # span W1 bottom half (acts on h_j)
    b1 = jnp.zeros((SPAN_MID,), jnp.float32)
    w2 = n((SPAN_MID,))
    b2 = jnp.zeros((), jnp.float32)

    # ---- Pack into one lane-dense 128-column projection (padded columns are zero) ----
    wp = jnp.zeros((HIDDEN, P_PROJ), jnp.float32)
    wp = wp.at[:, :SPAN_MID].set(w1a)
    wp = wp.at[:, SPAN_MID:SPAN_MID + 2].set(ws)
    wp = wp.at[:, SPAN_MID + 2:SPAN_MID + 4].set(we)

    bp = jnp.zeros((1, P_PROJ), jnp.float32)
    bp = bp.at[0, :SPAN_MID].set(b1)                              # b1 folded into `a` only
    bp = bp.at[0, SPAN_MID:SPAN_MID + 2].set(bs)
    bp = bp.at[0, SPAN_MID + 2:SPAN_MID + 4].set(be)

    head = {
        "wp": wp,                                # (H, 128)
        "bp": bp,                                # (1, 128)
        "w1bT": w1b.T,                           # (M, H) — gives cT = W1_bot^T @ h^T directly
        "w2": w2.reshape(SPAN_MID, 1),           # (M, 1)
        "b2": b2.reshape(1, 1),                  # SMEM scalar
    }
    return {"bert": bert, "head": head}


# -----------------------------------------------------------------------------
# Losses (match CrossEntropyLoss / BCEWithLogitsLoss, both mean-reduced)
# -----------------------------------------------------------------------------
def cross_entropy(logits, labels):
    logp = jax.nn.log_softmax(logits, axis=-1)
    return -jnp.mean(jnp.take_along_axis(logp, labels[:, None], axis=-1))


def bce_with_logits(logits, targets):
    return jnp.mean(jnp.maximum(logits, 0.0) - logits * targets
                    + jnp.log1p(jnp.exp(-jnp.abs(logits))))


# -----------------------------------------------------------------------------
# BertQueryNER.forward equivalent
# -----------------------------------------------------------------------------
def bert_query_ner_forward(params, input_ids, token_type_ids=None, attention_mask=None,
                           start_positions=None, end_positions=None, span_positions=None):
    B, S = input_ids.shape
    if token_type_ids is None:
        token_type_ids = jnp.zeros_like(input_ids)
    if attention_mask is None:
        attention_mask = jnp.ones_like(input_ids)

    sequence_output, _pooled = bert_forward(params["bert"], input_ids,
                                            token_type_ids, attention_mask)

    start_logits, end_logits, span_logits = ner_head(sequence_output, params["head"])

    if start_positions is not None and end_positions is not None:
        start_loss = cross_entropy(start_logits.reshape(-1, 2),
                                   start_positions.reshape(-1).astype(jnp.int32))
        end_loss = cross_entropy(end_logits.reshape(-1, 2),
                                 end_positions.reshape(-1).astype(jnp.int32))
        span_loss = bce_with_logits(span_logits.reshape(B, -1),
                                    span_positions.reshape(B, -1).astype(jnp.float32))
        return W_START * start_loss + W_END * end_loss + W_SPAN * span_loss
    else:
        span_prob = jax.nn.sigmoid(span_logits)
        start_pred = jnp.argmax(start_logits, axis=-1)
        end_pred = jnp.argmax(end_logits, axis=-1)
        return start_pred, end_pred, span_prob


# -----------------------------------------------------------------------------
# Main
# -----------------------------------------------------------------------------
if __name__ == "__main__":
    root = jax.random.PRNGKey(0)
    k_param, k_ids, k_start, k_end, k_span = jax.random.split(root, 5)

    params = init_params(k_param)

    input_ids = jax.random.randint(k_ids, (BATCH, SEQ), 0, VOCAB, dtype=jnp.int32)
    token_type_ids = jnp.zeros((BATCH, SEQ), jnp.int32)
    attention_mask = jnp.ones((BATCH, SEQ), jnp.int32)

    # Inference branch
    start_pred, end_pred, span_prob = bert_query_ner_forward(
        params, input_ids, token_type_ids, attention_mask)

    # Training / loss branch with synthetic labels
    start_positions = jax.random.bernoulli(k_start, 0.3, (BATCH, SEQ, 1)).astype(jnp.int32)
    end_positions = jax.random.bernoulli(k_end, 0.3, (BATCH, SEQ, 1)).astype(jnp.int32)
    span_positions = jax.random.bernoulli(k_span, 0.1, (BATCH, SEQ, SEQ)).astype(jnp.int32)
    total_loss = bert_query_ner_forward(
        params, input_ids, token_type_ids, attention_mask,
        start_positions, end_positions, span_positions)

    jax.block_until_ready((start_pred, end_pred, span_prob, total_loss))

    assert start_pred.shape == (BATCH, SEQ)
    assert end_pred.shape == (BATCH, SEQ)
    assert span_prob.shape == (BATCH, SEQ, SEQ)
    assert total_loss.shape == ()
    assert bool(jnp.isfinite(total_loss))
    print("KERNEL_OK")
</pallas_src>

<mosaic_0001>
module attributes {stable_mosaic.version = 11 : i64} {
  func.func @ner_head_kernel(%arg0: i32, %arg1: i32, %arg2: memref<1x8x32xbf16, #tpu.memory_space<vmem>>, %arg3: memref<1x32x8xbf16, #tpu.memory_space<vmem>>, %arg4: memref<32x128xbf16, #tpu.memory_space<vmem>>, %arg5: memref<1x128xf32, #tpu.memory_space<vmem>>, %arg6: memref<32x32xbf16, #tpu.memory_space<vmem>>, %arg7: memref<32x1xf32, #tpu.memory_space<vmem>>, %arg8: memref<1x1xf32, #tpu.memory_space<smem>>, %arg9: memref<1x8x128xf32, #tpu.memory_space<vmem>>, %arg10: memref<1x8x8xf32, #tpu.memory_space<vmem>>) attributes {dimension_semantics = [#tpu.dimension_semantics<parallel>, #tpu.dimension_semantics<parallel>], iteration_bounds = array<i64: 2, 1>, scalar_prefetch = 0 : i64, scratch_operands = 0 : i64, tpu.core_type = #tpu.core_type<tc>, window_params = [{transform_indices = @transform_0, window_bounds = array<i64: 1, 8, 32>}, {transform_indices = @transform_1, window_bounds = array<i64: 1, 32, 8>}, {pipeline_mode = #tpu.pipeline_mode<synchronous>, transform_indices = @transform_2, window_bounds = array<i64: 32, 128>}, {pipeline_mode = #tpu.pipeline_mode<synchronous>, transform_indices = @transform_3, window_bounds = array<i64: 1, 128>}, {pipeline_mode = #tpu.pipeline_mode<synchronous>, transform_indices = @transform_4, window_bounds = array<i64: 32, 32>}, {pipeline_mode = #tpu.pipeline_mode<synchronous>, transform_indices = @transform_5, window_bounds = array<i64: 32, 1>}, {transform_indices = @transform_6, window_bounds = array<i64: 1, 1>}, {transform_indices = @transform_7, window_bounds = array<i64: 1, 8, 128>}, {transform_indices = @transform_8, window_bounds = array<i64: 1, 8, 8>}]} {
    %c0 = arith.constant 0 : index
    %c0_0 = arith.constant 0 : index
    %c0_1 = arith.constant 0 : index
    %0 = vector.load %arg2[%c0, %c0_0, %c0_1] : memref<1x8x32xbf16, #tpu.memory_space<vmem>>, vector<1x8x32xbf16>
    %1 = vector.shape_cast %0 : vector<1x8x32xbf16> to vector<8x32xbf16>
    %c0_2 = arith.constant 0 : index
    %c0_3 = arith.constant 0 : index
    %c0_4 = arith.constant 0 : index
    %2 = vector.load %arg3[%c0_2, %c0_3, %c0_4] : memref<1x32x8xbf16, #tpu.memory_space<vmem>>, vector<1x32x8xbf16>
    %3 = vector.shape_cast %2 : vector<1x32x8xbf16> to vector<32x8xbf16>
    %c0_5 = arith.constant 0 : index
    %c0_6 = arith.constant 0 : index
    %4 = vector.load %arg4[%c0_5, %c0_6] : memref<32x128xbf16, #tpu.memory_space<vmem>>, vector<32x128xbf16>
    %cst = arith.constant dense<0.000000e+00> : vector<8x128xf32>
    %5 = tpu.matmul %1, %4, %cst {dimension_numbers = #tpu.dot_dimension_numbers<[1], [0], [0], [1], [0, 0, 1, 1], [], []>} : vector<8x32xbf16>, vector<32x128xbf16>, vector<8x128xf32> -> vector<8x128xf32>
    %c0_7 = arith.constant 0 : index
    %c0_8 = arith.constant 0 : index
    %6 = vector.load %arg5[%c0_7, %c0_8] : memref<1x128xf32, #tpu.memory_space<vmem>>, vector<1x128xf32>
    %7 = vector.broadcast %6 : vector<1x128xf32> to vector<8x128xf32>
    %8 = arith.addf %5, %7 : vector<8x128xf32>
    %c0_9 = arith.constant 0 : index
    %c0_10 = arith.constant 0 : index
    %c0_11 = arith.constant 0 : index
    %9 = vector.load %arg9[%c0_9, %c0_10, %c0_11] : memref<1x8x128xf32, #tpu.memory_space<vmem>>, vector<1x8x128xf32>
    %10 = vector.shape_cast %9 : vector<1x8x128xf32> to vector<8x128xf32>
    %11 = vector.shape_cast %8 : vector<8x128xf32> to vector<1x8x128xf32>
    tpu.vector_store %arg9[%c0_9, %c0_10, %c0_11], %11 {strides = array<i32>} : memref<1x8x128xf32, #tpu.memory_space<vmem>>, vector<1x8x128xf32>,
    %c0_12 = arith.constant 0 : index
    %c0_13 = arith.constant 0 : index
    %12 = vector.load %arg6[%c0_12, %c0_13] : memref<32x32xbf16, #tpu.memory_space<vmem>>, vector<32x32xbf16>
    %cst_14 = arith.constant dense<0.000000e+00> : vector<32x8xf32>
    %13 = tpu.matmul %12, %3, %cst_14 {dimension_numbers = #tpu.dot_dimension_numbers<[1], [0], [0], [1], [0, 0, 1, 1], [], []>} : vector<32x32xbf16>, vector<32x8xbf16>, vector<32x8xf32> -> vector<32x8xf32>
    %14 = vector.extract_strided_slice %8 {offsets = [0, 0], sizes = [8, 32], strides = [1, 1]} : vector<8x128xf32> to vector<8x32xf32>
    %15 = vector.shape_cast %14 : vector<8x32xf32> to vector<8x32x1xf32>
    %16 = vector.shape_cast %13 : vector<32x8xf32> to vector<1x32x8xf32>
    %17 = vector.broadcast %15 : vector<8x32x1xf32> to vector<8x32x8xf32>
    %18 = vector.broadcast %16 : vector<1x32x8xf32> to vector<8x32x8xf32>
    %19 = arith.addf %17, %18 : vector<8x32x8xf32>
    %cst_15 = arith.constant 5.000000e-01 : f32
    %20 = vector.broadcast %cst_15 : f32 to vector<8x32x8xf32>
    %21 = arith.mulf %20, %19 : vector<8x32x8xf32>
    %cst_16 = arith.constant 4.471500e-02 : f32
    %22 = vector.broadcast %cst_16 : f32 to vector<8x32x8xf32>
    %23 = arith.mulf %22, %19 : vector<8x32x8xf32>
    %24 = arith.mulf %23, %19 : vector<8x32x8xf32>
    %25 = arith.mulf %24, %19 : vector<8x32x8xf32>
    %26 = arith.addf %19, %25 : vector<8x32x8xf32>
    %cst_17 = arith.constant 0.797884583 : f32
    %27 = vector.broadcast %cst_17 : f32 to vector<8x32x8xf32>
    %28 = arith.mulf %27, %26 : vector<8x32x8xf32>
    %29 = math.tanh %28 : vector<8x32x8xf32>
    %cst_18 = arith.constant 1.000000e+00 : f32
    %30 = vector.broadcast %cst_18 : f32 to vector<8x32x8xf32>
    %31 = arith.addf %30, %29 : vector<8x32x8xf32>
    %32 = arith.mulf %21, %31 : vector<8x32x8xf32>
    %c0_19 = arith.constant 0 : index
    %c0_20 = arith.constant 0 : index
    %33 = vector.load %arg7[%c0_19, %c0_20] : memref<32x1xf32, #tpu.memory_space<vmem>>, vector<32x1xf32>
    %34 = vector.shape_cast %33 : vector<32x1xf32> to vector<1x32x1xf32>
    %35 = vector.broadcast %34 : vector<1x32x1xf32> to vector<8x32x8xf32>
    %36 = arith.mulf %32, %35 : vector<8x32x8xf32>
    %cst_21 = arith.constant dense<0.000000e+00> : vector<8x8xf32>
    %37 = vector.multi_reduction <add>, %36, %cst_21 [1] : vector<8x32x8xf32> to vector<8x8xf32>
    %c0_22 = arith.constant 0 : index
    %c0_23 = arith.constant 0 : index
    %38 = memref.load %arg8[%c0_22, %c0_23] : memref<1x1xf32, #tpu.memory_space<smem>>
    %39 = vector.broadcast %38 : f32 to vector<8x8xf32>
    %40 = arith.addf %37, %39 : vector<8x8xf32>
    %c0_24 = arith.constant 0 : index
    %c0_25 = arith.constant 0 : index
    %c0_26 = arith.constant 0 : index
    %41 = vector.load %arg10[%c0_24, %c0_25, %c0_26] : memref<1x8x8xf32, #tpu.memory_space<vmem>>, vector<1x8x8xf32>
    %42 = vector.shape_cast %41 : vector<1x8x8xf32> to vector<8x8xf32>
    %43 = vector.shape_cast %40 : vector<8x8xf32> to vector<1x8x8xf32>
    tpu.vector_store %arg10[%c0_24, %c0_25, %c0_26], %43 {strides = array<i32>} : memref<1x8x8xf32, #tpu.memory_space<vmem>>, vector<1x8x8xf32>,
    return
  }
  func.func @transform_0(%arg0: i32, %arg1: i32) -> (i32, i32, i32) {
    %c0_i32 = arith.constant 0 : i32
    %c0_i32_0 = arith.constant 0 : i32
    return %arg0, %arg1, %c0_i32 : i32, i32, i32
  }
  func.func @transform_1(%arg0: i32, %arg1: i32) -> (i32, i32, i32) {
    %c0_i32 = arith.constant 0 : i32
    %c0_i32_0 = arith.constant 0 : i32
    %c0_i32_1 = arith.constant 0 : i32
    return %arg0, %c0_i32, %c0_i32_0 : i32, i32, i32
  }
  func.func @transform_2(%arg0: i32, %arg1: i32) -> (i32, i32) {
    %c0_i32 = arith.constant 0 : i32
    %c0_i32_0 = arith.constant 0 : i32
    %c0_i32_1 = arith.constant 0 : i32
    return %c0_i32, %c0_i32_0 : i32, i32
  }
  func.func @transform_3(%arg0: i32, %arg1: i32) -> (i32, i32) {
    %c0_i32 = arith.constant 0 : i32
    %c0_i32_0 = arith.constant 0 : i32
    %c0_i32_1 = arith.constant 0 : i32
    return %c0_i32, %c0_i32_0 : i32, i32
  }
  func.func @transform_4(%arg0: i32, %arg1: i32) -> (i32, i32) {
    %c0_i32 = arith.constant 0 : i32
    %c0_i32_0 = arith.constant 0 : i32
    %c0_i32_1 = arith.constant 0 : i32
    return %c0_i32, %c0_i32_0 : i32, i32
  }
  func.func @transform_5(%arg0: i32, %arg1: i32) -> (i32, i32) {
    %c0_i32 = arith.constant 0 : i32
    %c0_i32_0 = arith.constant 0 : i32
    %c0_i32_1 = arith.constant 0 : i32
    return %c0_i32, %c0_i32_0 : i32, i32
  }
  func.func @transform_6(%arg0: i32, %arg1: i32) -> (i32, i32) {
    %c0_i32 = arith.constant 0 : i32
    %c0_i32_0 = arith.constant 0 : i32
    %c0_i32_1 = arith.constant 0 : i32
    return %c0_i32, %c0_i32_0 : i32, i32
  }
  func.func @transform_7(%arg0: i32, %arg1: i32) -> (i32, i32, i32) {
    %c0_i32 = arith.constant 0 : i32
    %c0_i32_0 = arith.constant 0 : i32
    return %arg0, %arg1, %c0_i32 : i32, i32, i32
  }
  func.func @transform_8(%arg0: i32, %arg1: i32) -> (i32, i32, i32) {
    %c0_i32 = arith.constant 0 : i32
    %c0_i32_0 = arith.constant 0 : i32
    return %arg0, %arg1, %c0_i32 : i32, i32, i32
  }
}

</mosaic_0001>

<bundles_post_ra>
// kernel: tpu_custom_call.1
= control target key start
LH: loop header
LB: loop body
LE: loop exit
PB: predicated region body
PF: predicated region fallthrough
CT: control target
= control target key end

     0   :  { %s2107_s0 = inlined_call_operand.vmem [shape: bf16[2,8,32], index: 0, kind: input, shape index: {}]   ;;  %s2108_s1 = inlined_call_operand.vmem [shape: bf16[2,32,8], index: 1, kind: input, shape index: {}]   ;;  %s2109_s2 = inlined_call_operand.vmem [shape: bf16[32,128], index: 2, kind: input, shape index: {}]   ;;  %s2110_s3 = inlined_call_operand.vmem [shape: f32[1,128], index: 3, kind: input, shape index: {}]   ;;  %s2111_s4 = inlined_call_operand.vmem [shape: bf16[32,32], index: 4, kind: input, shape index: {}]   ;;  %s2112_s5 = inlined_call_operand.vmem [shape: f32[32,1], index: 5, kind: input, shape index: {}]   ;;  %s2113_s6 = inlined_call_operand.<no memory space> [shape: f32[1,1], index: 6, kind: input, shape index: {}]   ;;  %s2114_s7 = inlined_call_operand.hbm [shape: f32[2,8,128], index: 7, kind: output, shape index: {0}]   ;;  %s2115_s8 = inlined_call_operand.hbm [shape: f32[2,8,8], index: 8, kind: output, shape index: {1}]  }
   0x1   :  { %14 = sst [smem:[#allocation2]] %s2113_s6 }
   0x2   :  { %15 = vsyncpa [#allocation4], 0 }
   0x3   :  { %17 = vsyncpa [#allocation4 + $0x1], 0 }
   0x4   :  { %18 = vsyncpa [#allocation6], 0 }
   0x5   :  { %20 = vsyncpa [#allocation6 + $0x1], 0  ;;  %s1678_s29 = smov 0   ;;  %s1680_s30 = smov 0  }
   0x6   :  { %s1682_s9 = smov 0   ;;  %s1684_s10 = smov 0  }
   0x7   :  { %s1686_s11 = smov 0   ;;  %s1688_s12 = smov 0  }
   0x8 LB: > { %s1332_s6 = sadd.s32 4294967295, %s1623_s12   ;;  %s1333_s13 = sadd.s32 4294967294, %s1623_s12   ;;  %s1623_s12 = sphi %s1688_s12, %s26_s12   ;;  %s1619_s11 = sphi %s1686_s11, %s2126_s11   ;;  %s1615_s10 = sphi %s1684_s10, %s2125_s10   ;;  %s1611_s9 = sphi %s1682_s9, %s2124_s9   ;;  %s1607_s30 = sphi %s1680_s30, %s2123_s30   ;;  %s1603_s29 = sphi %s1678_s29, %s2122_s29  }
   0x9   : > { %s38_s14 = sadd.s32 1, %s1619_s11  ;;  %s206_s15 = sadd.s32 1, %s1611_s9 }
   0xa   : > { %p40_p0 = scmp.ge.s32.totalorder %s38_s14, 2  ;;  %p216_p1 = scmp.ne.s32.totalorder %s1611_s9, %s1607_s30 }
   0xb   : > { %p217_p2 = scmp.eq.s32.totalorder %s1332_s6, 1  ;;  %p222_p3 = scmp.ne.s32.totalorder %s1607_s30, %s1603_s29 }
   0xc   : > { %s2128_s14 = smov (%p40_p0, %s38_s14), 0  ;;  %p223_p5 = scmp.eq.s32.totalorder %s1333_s13, 1 }
   0xd   : > { %p1718_p4 = por %p217_p2, %p216_p1  ;;  %s201_s17 = ssub.s32 %s1619_s11, %s2128_s14 }
   0xe   : > { %p1336_p6 = scmp.ge.s32.totalorder %s1623_s12, 1  ;;  %p204_p7 = scmp.eq.s32.totalorder %s201_s17, 0 }
   0xf   : > { %p1725_p8 = por %p223_p5, %p222_p3  ;;  %p302_p9 = scmp.lt.s32.totalorder %s1623_s12, 3 }
  0x10   : > { %s1731_s19 = scalar_select %p204_p7, %s1611_s9, %s206_s15  }
  0x11   : > { %p303_p10 = pnand %p1336_p6, %p302_p9 }
  0x12   : > { %p348_p11 = scmp.lt.s32.totalorder (!%p303_p10), %s1615_s10, 1  ;;  %s1757_s24 = sand.u32 (!%p303_p10), 1, %s1607_s30  }
  0x13   : > { %306 = sbr.rel (%p303_p10) target bundleno = 485 (0x1e5), region = 48  ;;  %s2117_s25 = sshll.u32 (!%p303_p10), %s1757_s24, 3 }
  0x14   : > { %s1183_s17 = scalar_lea.sflag (!%p303_p10), [#allocation4], %s1757_s24 }
  0x18   : > { %v1447_v0 = vld [vmem:[%s2109_s2 + $0x8] sm:$0xff]   ;;  %v1625_v1 = vmov 0.0   ;;  %v1448_v2 = vld [vmem:[%s2109_s2] sm:$0xff]   ;;  %vm1626_vm0 = vmmov 0   ;;  %s349_s26 = scalar_select %p348_p11, %s1615_s10, 1  ;;  %vm389_vm1 = vcmask 261120   ;;  %v515_v9 = vlaneseq }
  0x19   : > { %1366 = vmatprep.subr.bf16.mxu0 %v1625_v1  ;;  %1370 = vmatprep.mubr.msk.bf16.mxu0 %vm1626_vm0, %v1625_v1  ;;  %v1451_v3 = vld [vmem:[%s2111_s4] sm:$0xff]   ;;  %v1452_v7 = vld [vmem:[%s2111_s4 + $0x8] sm:$0xff]   ;;  %v1627_v8 = vmov 0   ;;  %v989_v35 = vld [vmem:[%s2112_s5 + $0x10] sm:$0xff] }
  0x1a   : > { %1367 = vmatpush3.bf16.msra.mxu0 %v1447_v0  ;;  %1378 = vmatprep.mubr.msk.bf16.mxu1 %vm389_vm1, %v1451_v3  ;;  %s1339_s27 = sshll.u32 %s349_s26, 2  ;;  %s1358_s28 = sshll.u32 %s349_s26, 4  ;;  %v516_v10 = vshrl.u32 %v515_v9, 7  ;;  %v1342_v11 = vld [vmem:[%s2110_s3] ss:$0 sm:$0xff]  ;;  %v988_v33 = vld [vmem:[%s2112_s5 + $0x8] sm:$0xff] }
  0x1b   : > { %1368 = vmatprep.subr.bf16.mxu0 %v1625_v1  ;;  %s354_s15 = scalar_lea.vmem %s2107_s0, %s1339_s27  ;;  %s359_s21 = scalar_lea.vmem %s2108_s1, %s1358_s28  ;;  %1446 = vset.pattern.permute.xlu1 %v1627_v8  ;;  %v987_v34 = vld [vmem:[%s2112_s5] sm:$0xff]  ;;  %v990_v36 = vld [vmem:[%s2112_s5 + $0x18] sm:$0xff] }
  0x1c   : > { %v361_v4 = vld [vmem:[%s354_s15] sm:$0xf]  ;;  %v1449_v5 = vld [vmem:[%s359_s21 + $0x8] sm:$0xff]   ;;  %1445 = vset.pattern.permute.xlu0 %v1627_v8  ;;  %v536_v12 = vsub.s32 1, %v516_v10  ;;  %v517_v13 = vsub.s32 0, %v516_v10  ;;  %s1765_s28 = scalar_lea.vmem [#allocation3], %s2117_s25 }
  0x1d   : > { %v1450_v6 = vld [vmem:[%s359_s21] sm:$0xff]   ;;  %1374 = vmatprep.subr.bf16.mxu1 %v1449_v5  ;;  %v555_v21 = vsub.s32 2, %v516_v10  ;;  %v574_v23 = vsub.s32 3, %v516_v10  ;;  %v593_v25 = vsub.s32 4, %v516_v10  ;;  %v612_v27 = vsub.s32 5, %v516_v10  ;;  %s2116_s26 = sshll.u32 %s1615_s10, 7 }
  0x1e   : > { %1369 = vmatpush3.bf16.msra.mxu0 %v1448_v2  ;;  %1375 = vmatpush3.bf16.msra.mxu1 %v1449_v5  ;;  %v631_v29 = vsub.s32 6, %v516_v10  ;;  %v650_v31 = vsub.s32 7, %v516_v10  ;;  %s1786_s13 = scalar_lea.hbm %s2114_s7, %s2116_s26  ;;  %s1202_s15 = sshll.u32 %s1765_s28, 4  ;;  %s1203_s15 = int_to_ptr.vmem [resolvable:$true] %s1202_s15 }
  0x1f   : > { %1376 = vmatprep.subr.bf16.mxu1 %v1450_v6  ;;  %s1517_s20 = scalar_lea.vmem %s1203_s15, 128  ;;  %s1628_s21 = smov [#allocation3]  }
  0x20   : > { %p1518_p12 = scmp.ne.s32.totalorder %s1203_s15, %s1517_s20  ;;  %s1521_s22 = sshll.u32 %s1628_s21, 4  ;;  %s1522_s22 = int_to_ptr.vmem [resolvable:$false] %s1521_s22 }
  0x21   : > { %1371 = vmatmul.mubr.msk.bf16.vlgmr.msra.gmra.mxu0 %vm389_vm1, %v361_v4  ;;  %s1523_s23 = scalar_lea.vmem %s1522_s22, 256  ;;  %p1524_p1 = scmp.lt.s32.totalorder %s1203_s15, %s1522_s22 }
  0x22   : > { %1377 = vmatpush3.bf16.msra.mxu1 %v1450_v6  ;;  %p1519_p13 = pnand %p1518_p12, %p1718_p4  ;;  %p1525_p2 = scmp.lt.s32.totalorder %s1523_s23, %s1517_s20 }
  0x24   : > { %p1520_p0 = pneg %p1519_p13  ;;  %p1526_p3 = por %p1525_p2, %p1524_p1 }
  0x25   : > { %1379 = vmatmul.mubr.msk.bf16.vlgmr.msra.gmra.mxu1 %vm389_vm1, %v1452_v7 }
  0x26   : > { %p1527_p5 = pnand %p1526_p3, %p1520_p0 }
  0xe1   : > { %v427_v14 = vpop.f32.mrf.mxu0 }
  0xe2   : > { %v428_v15 = vadd.f32 %v1342_v11, %v427_v14 }
  0xe3   : > { %v1372_v16 = vpop.f32.mrf.mxu0 }
  0xe4   : > { %v537_v17 = vrot.slane %v428_v15, %v536_v12  ;;  %v518_v18 = vrot.slane %v428_v15, %v517_v13  ;;  %433 = vst [vmem:[%s1765_s28] sm:$0xff] %v428_v15  ;;  %v556_v22 = vrot.slane %v428_v15, %v555_v21  ;;  %v575_v24 = vrot.slane %v428_v15, %v574_v23 }
  0xe5   : > { %v430_v19 = vpop.f32.mrf.mxu0  ;;  %v594_v26 = vrot.slane %v428_v15, %v593_v25  ;;  %v613_v28 = vrot.slane %v428_v15, %v612_v27  ;;  %v632_v30 = vrot.slane %v428_v15, %v631_v29  ;;  %v651_v32 = vrot.slane %v428_v15, %v650_v31  ;;  %v1789_v37 = vpop.f32.mrf.mxu1 }
  0xe6   : > { %539 = vbcast.lane.b32.xlu1 %v537_v17, 256  ;;  %520 = vbcast.lane.b32.xlu0 %v518_v18, 256 }
  0xe7   : > { %v1373_v20 = vpop.f32.mrf.mxu0 }
  0xea   : > { %543 = vbcast.lane.b32.xlu1 %v537_v17, 264  ;;  %524 = vbcast.lane.b32.xlu0 %v518_v18, 264 }
  0xee   : > { %562 = vbcast.lane.b32.xlu1 %v556_v22, 264  ;;  %558 = vbcast.lane.b32.xlu0 %v556_v22, 256 }
  0xf2   : > { %547 = vbcast.lane.b32.xlu1 %v537_v17, 272  ;;  %528 = vbcast.lane.b32.xlu0 %v518_v18, 272 }
  0xf6   : > { %581 = vbcast.lane.b32.xlu1 %v575_v24, 264  ;;  %577 = vbcast.lane.b32.xlu0 %v575_v24, 256 }
  0xfa   : > { %596 = vbcast.lane.b32.xlu1 %v594_v26, 256  ;;  %566 = vbcast.lane.b32.xlu0 %v556_v22, 272 }
  0xfe   : > { %532 = vbcast.lane.b32.xlu1 %v518_v18, 280  ;;  %600 = vbcast.lane.b32.xlu0 %v594_v26, 264 }
 0x102   : > { %585 = vbcast.lane.b32.xlu1 %v575_v24, 272  ;;  %551 = vbcast.lane.b32.xlu0 %v537_v17, 280 }
 0x106   : > { %619 = vbcast.lane.b32.xlu1 %v613_v28, 264  ;;  %615 = vbcast.lane.b32.xlu0 %v613_v28, 256 }
 0x10a   : > { %604 = vbcast.lane.b32.xlu1 %v594_v26, 272  ;;  %570 = vbcast.lane.b32.xlu0 %v556_v22, 280 }
 0x10e   : > { %638 = vbcast.lane.b32.xlu1 %v632_v30, 264  ;;  %634 = vbcast.lane.b32.xlu0 %v632_v30, 256 }
 0x112   : > { %623 = vbcast.lane.b32.xlu1 %v613_v28, 272  ;;  %589 = vbcast.lane.b32.xlu0 %v575_v24, 280 }
 0x116   : > { %657 = vbcast.lane.b32.xlu1 %v651_v32, 264  ;;  %653 = vbcast.lane.b32.xlu0 %v651_v32, 256 }
 0x11a   : > { %642 = vbcast.lane.b32.xlu1 %v632_v30, 272  ;;  %608 = vbcast.lane.b32.xlu0 %v594_v26, 280 }
 0x11e   : > { %661 = vbcast.lane.b32.xlu1 %v651_v32, 272  ;;  %627 = vbcast.lane.b32.xlu0 %v613_v28, 280 }
 0x122   : > { %665 = vbcast.lane.b32.xlu1 %v651_v32, 280  ;;  %646 = vbcast.lane.b32.xlu0 %v632_v30, 280 }
 0x126   : > { %998 = vperm.xlu1 %1446, %v988_v33   ;;  %993 = vperm.xlu0 %1445, %v987_v34  }
 0x12a   : > { %1003 = vperm.xlu1 %1446, %v989_v35   ;;  %1008 = vperm.xlu0 %1445, %v990_v36  }
 0x12b   : > { %1530 = shalt.err (!%p1527_p5)
}
 0x12c   : > { %s1531_s28 = scalar_lea.hbm %s1786_s13, 128  ;;  %s1535_s21 = scalar_lea.hbm %s2114_s7, 256 }
 0x12d   : > { %p1532_p6 = scmp.ne.s32.totalorder %s1786_s13, %s1531_s28  ;;  %p1536_p10 = scmp.lt.s32.totalorder %s1786_s13, %s2114_s7 }
 0x12e   : > { %p1537_p11 = scmp.lt.s32.totalorder %s1535_s21, %s1531_s28 }
 0x12f   : > { %p1533_p7 = pnand %p1532_p6, %p1718_p4 }
 0x130   : > { %p1538_p12 = por %p1537_p11, %p1536_p10 }
 0x131   : > { %p1534_p9 = pneg %p1533_p7 }
 0x133   : > { %p1539_p13 = pnand %p1538_p12, %p1534_p9 }
 0x135   : > { %1542 = shalt.err (!%p1539_p13)
}
 0x136   : > { %1382 = dma.vmem_to_hbm [thread:$0]  (%p1718_p4), %s1203_s15, 128, %s1786_s13, %s1183_s17   ;;  %v1808_v38 = vpop.f32.mrf.mxu1  ;;  %vm1043_vm2 = vcmask 64512   ;;  %vm1166_vm3 = vcmask 1041409   ;;  %vm1168_vm4 = vcmask 1042434   ;;  %vm1170_vm5 = vcmask 1043459  }
 0x137   : > { %s1148_s20 = sld [smem:[#allocation2]]  ;;  %vm1172_vm6 = vcmask 1044484   ;;  %vm1174_vm7 = vcmask 1045509   ;;  %vm1176_vm8 = vcmask 1046534   ;;  %s2120_s25 = sshll.u32 %s1757_s24, 3  ;;  %vm1178_vm9 = vcmask 1047559  }
 0x138   : > { %v1810_v39 = vpop.f32.mrf.mxu1  ;;  %s347_s26 = scalar_lea.vmem [#allocation5], %s2120_s25  ;;  %s2121_s15 = sshll.u32 %s1615_s10, 7 }
 0x139   : > { %s1216_s13 = sshll.u32 %s347_s26, 4  ;;  %s2065_s23 = scalar_lea.hbm %s2115_s8, %s2121_s15  ;;  %s1217_s13 = int_to_ptr.vmem [resolvable:$true] %s1216_s13 }
 0x13a   : > { %v1814_v44 = vpop.f32.mrf.mxu1  ;;  %s1188_s28 = scalar_lea.sflag [#allocation6], %s1757_s24  ;;  %s1543_s27 = scalar_lea.vmem %s1217_s13, 128 }
 0x13b   : > { %p1544_p0 = scmp.ne.s32.totalorder %s1217_s13, %s1543_s27  ;;  %s1629_s6 = smov [#allocation5]  }
 0x13c   : > { %s1547_s21 = sshll.u32 %s1629_s6, 4  ;;  %s1548_s21 = int_to_ptr.vmem [resolvable:$false] %s1547_s21 }
 0x13d   : > { %v1820_v60 = vstv %s1148_s20  ;;  %p1545_p1 = pnand %p1544_p0, %p1718_p4  ;;  %s1549_s20 = scalar_lea.vmem %s1548_s21, 256 }
 0x13e   : > { %p1550_p3 = scmp.lt.s32.totalorder %s1217_s13, %s1548_s21  ;;  %p1551_p5 = scmp.lt.s32.totalorder %s1549_s20, %s1543_s27 }
 0x13f   : > { %p1546_p2 = pneg %p1545_p1 }
 0x140   : > { %p1552_p6 = por %p1551_p5, %p1550_p3 }
 0x142   : > { %p1553_p7 = pnand %p1552_p6, %p1546_p2 }
 0x158   : > { %v540_v40 = vpop.permute.xlu1 %539  ;;  %v521_v41 = vpop.permute.xlu0 %520 }
 0x159   : > { %v671_v42 = vadd.f32 %v540_v40, %v1808_v38  ;;  %v667_v43 = vadd.f32 %v521_v41, %v1808_v38 }
 0x15b   : > { %v735_v45 = vmul.f32 0.044715, %v671_v42  ;;  %v731_v46 = vmul.f32 0.044715, %v667_v43  ;;  %v1818_v56 = vmul.f32 0.5, %v671_v42  ;;  %v1823_v1 = vmul.f32 0.5, %v667_v43 }
 0x15c   : > { %v544_v47 = vpop.permute.xlu1 %543  ;;  %v525_v48 = vpop.permute.xlu0 %524 }
 0x15d   : > { %v767_v49 = vmul.f32 %v735_v45, %v671_v42  ;;  %v763_v50 = vmul.f32 %v731_v46, %v667_v43  ;;  %v672_v51 = vadd.f32 %v544_v47, %v1814_v44  ;;  %v668_v52 = vadd.f32 %v525_v48, %v1814_v44 }
 0x15f   : > { %v799_v53 = vmul.f32 %v767_v49, %v671_v42  ;;  %v795_v54 = vmul.f32 %v763_v50, %v667_v43  ;;  %v736_v55 = vmul.f32 0.044715, %v672_v51  ;;  %v732_v57 = vmul.f32 0.044715, %v668_v52 }
 0x160   : > { %v563_v58 = vpop.permute.xlu1 %562  ;;  %v559_v59 = vpop.permute.xlu0 %558  ;;  %v1825_v2 = vmul.f32 0.5, %v672_v51  ;;  %v1828_v8 = vmul.f32 0.5, %v668_v52 }
 0x161   : > { %v831_v61 = vadd.f32 %v799_v53, %v671_v42  ;;  %v827_v62 = vadd.f32 %v795_v54, %v667_v43  ;;  %v768_v63 = vmul.f32 %v736_v55, %v672_v51  ;;  %v676_v0 = vadd.f32 %v563_v58, %v1814_v44 }
 0x162   : > { %v764_v3 = vmul.f32 %v732_v57, %v668_v52  ;;  %v675_v4 = vadd.f32 %v559_v59, %v1808_v38 }
 0x163   : > { %v863_v5 = vmul.f32 0.7978846, %v831_v61  ;;  %v859_v6 = vmul.f32 0.7978846, %v827_v62  ;;  %v800_v7 = vmul.f32 %v768_v63, %v672_v51  ;;  %v1830_v10 = vmul.f32 0.5, %v676_v0 }
 0x164   : > { %v796_v9 = vmul.f32 %v764_v3, %v668_v52  ;;  %v740_v11 = vmul.f32 0.044715, %v676_v0  ;;  %v739_v12 = vmul.f32 0.044715, %v675_v4  ;;  %v548_v13 = vpop.permute.xlu1 %547  ;;  %v529_v14 = vpop.permute.xlu0 %528  ;;  %v1834_v22 = vmul.f32 0.5, %v675_v4 }
 0x165   : > { %1453 = vtanh.f32 %v863_v5  ;;  %v832_v15 = vadd.f32 %v800_v7, %v672_v51  ;;  %v673_v16 = vadd.f32 %v1789_v37, %v548_v13  ;;  %v669_v17 = vadd.f32 %v1789_v37, %v529_v14 }
 0x166   : > { %1455 = vtanh.f32 %v859_v6  ;;  %v828_v18 = vadd.f32 %v796_v9, %v668_v52  ;;  %v772_v19 = vmul.f32 %v740_v11, %v676_v0  ;;  %v771_v20 = vmul.f32 %v739_v12, %v675_v4 }
 0x167   : > { %v864_v21 = vmul.f32 0.7978846, %v832_v15  ;;  %v1836_v23 = vmul.f32 0.5, %v673_v16  ;;  %v737_v24 = vmul.f32 0.044715, %v673_v16  ;;  %v1840_v41 = vmul.f32 0.5, %v669_v17 }
 0x168   : > { %v860_v25 = vmul.f32 0.7978846, %v828_v18  ;;  %v804_v26 = vmul.f32 %v772_v19, %v676_v0  ;;  %v803_v27 = vmul.f32 %v771_v20, %v675_v4  ;;  %v733_v28 = vmul.f32 0.044715, %v669_v17  ;;  %v582_v29 = vpop.permute.xlu1 %581  ;;  %v578_v30 = vpop.permute.xlu0 %577 }
 0x169   : > { %1457 = vtanh.f32 %v864_v21  ;;  %v769_v31 = vmul.f32 %v737_v24, %v673_v16  ;;  %v680_v32 = vadd.f32 %v582_v29, %v1814_v44  ;;  %v679_v33 = vadd.f32 %v578_v30, %v1808_v38 }
 0x16a   : > { %1459 = vtanh.f32 %v860_v25  ;;  %v836_v34 = vadd.f32 %v804_v26, %v676_v0  ;;  %v835_v35 = vadd.f32 %v803_v27, %v675_v4  ;;  %v765_v36 = vmul.f32 %v733_v28, %v669_v17 }
 0x16b   : > { %v801_v40 = vmul.f32 %v769_v31, %v673_v16  ;;  %v1842_v42 = vmul.f32 0.5, %v680_v32  ;;  %v744_v43 = vmul.f32 0.044715, %v680_v32  ;;  %v743_v48 = vmul.f32 0.044715, %v679_v33 }
 0x16c   : > { %v868_v45 = vmul.f32 0.7978846, %v836_v34  ;;  %v867_v46 = vmul.f32 0.7978846, %v835_v35  ;;  %v797_v47 = vmul.f32 %v765_v36, %v669_v17  ;;  %v597_v49 = vpop.permute.xlu1 %596  ;;  %v567_v50 = vpop.permute.xlu0 %566  ;;  %v1846_v57 = vmul.f32 0.5, %v679_v33 }
 0x16d   : > { %v833_v51 = vadd.f32 %v801_v40, %v673_v16  ;;  %v776_v52 = vmul.f32 %v744_v43, %v680_v32  ;;  %v683_v53 = vadd.f32 %v597_v49, %v1808_v38  ;;  %v677_v54 = vadd.f32 %v1789_v37, %v567_v50 }
 0x16e   : > { %1461 = vtanh.f32 %v868_v45  ;;  %v829_v55 = vadd.f32 %v797_v47, %v669_v17  ;;  %v775_v58 = vmul.f32 %v743_v48, %v679_v33 }
 0x16f   : > { %1463 = vtanh.f32 %v867_v46  ;;  %v865_v59 = vmul.f32 0.7978846, %v833_v51  ;;  %v808_v61 = vmul.f32 %v776_v52, %v680_v32  ;;  %v1848_v62 = vmul.f32 0.5, %v683_v53 }
 0x170   : > { %v861_v63 = vmul.f32 0.7978846, %v829_v55  ;;  %v807_v0 = vmul.f32 %v775_v58, %v679_v33  ;;  %v747_v3 = vmul.f32 0.044715, %v683_v53  ;;  %v1850_v4 = vmul.f32 0.5, %v677_v54  ;;  %v533_v5 = vpop.permute.xlu1 %532  ;;  %v601_v6 = vpop.permute.xlu0 %600 }
 0x171   : > { %1465 = vtanh.f32 %v865_v59  ;;  %v840_v7 = vadd.f32 %v808_v61, %v680_v32  ;;  %v741_v9 = vmul.f32 0.044715, %v677_v54  ;;  %v670_v11 = vadd.f32 %v1810_v39, %v533_v5 }
 0x172   : > { %v1454_v12 = vpop.eup %1453  ;;  %1467 = vtanh.f32 %v861_v63  ;;  %v839_v13 = vadd.f32 %v807_v0, %v679_v33  ;;  %v779_v14 = vmul.f32 %v747_v3, %v683_v53  ;;  %v684_v15 = vadd.f32 %v601_v6, %v1814_v44 }
 0x173   : > { %v1456_v16 = vpop.eup %1455  ;;  %v927_v17 = vadd.f32 1.0, %v1454_v12  ;;  %v872_v18 = vmul.f32 0.7978846, %v840_v7  ;;  %v773_v19 = vmul.f32 %v741_v9, %v677_v54  ;;  %v1854_v20 = vmul.f32 0.5, %v670_v11 }
 0x174   : > { %v923_v21 = vadd.f32 1.0, %v1456_v16  ;;  %v871_v24 = vmul.f32 0.7978846, %v839_v13  ;;  %v811_v25 = vmul.f32 %v779_v14, %v683_v53  ;;  %v734_v26 = vmul.f32 0.044715, %v670_v11  ;;  %v586_v27 = vpop.permute.xlu1 %585  ;;  %v552_v28 = vpop.permute.xlu0 %551 }
 0x175   : > { %v1857_v29 = vmul.f32 %v927_v17, %v1818_v56  ;;  %1469 = vtanh.f32 %v872_v18  ;;  %v805_v30 = vmul.f32 %v773_v19, %v677_v54  ;;  %v1859_v31 = vmul.f32 0.5, %v684_v15 }
 0x176   : > { %v1458_v32 = vpop.eup %1457  ;;  %v1862_v33 = vmul.f32 %v923_v21, %v1823_v1  ;;  %1471 = vtanh.f32 %v871_v24  ;;  %v843_v34 = vadd.f32 %v811_v25, %v683_v53  ;;  %v766_v35 = vmul.f32 %v734_v26, %v670_v11 }
 0x177   : > { %v1460_v36 = vpop.eup %1459  ;;  %v928_v40 = vadd.f32 1.0, %v1458_v32  ;;  %v837_v43 = vadd.f32 %v805_v30, %v677_v54  ;;  %v748_v45 = vmul.f32 0.044715, %v684_v15  ;;  %v681_v46 = vadd.f32 %v1789_v37, %v586_v27 }
 0x178   : > { %v924_v47 = vadd.f32 1.0, %v1460_v36  ;;  %v875_v56 = vmul.f32 0.7978846, %v843_v34  ;;  %v798_v48 = vmul.f32 %v766_v35, %v670_v11  ;;  %v674_v49 = vadd.f32 %v1810_v39, %v552_v28  ;;  %v620_v50 = vpop.permute.xlu1 %619  ;;  %v616_v51 = vpop.permute.xlu0 %615 }
 0x179   : > { %v1867_v52 = vmul.f32 %v928_v40, %v1825_v2  ;;  %v869_v1 = vmul.f32 0.7978846, %v837_v43  ;;  %v780_v55 = vmul.f32 %v748_v45, %v684_v15  ;;  %v1869_v53 = vmul.f32 0.5, %v681_v46 }
 0x17a   : > { %v1872_v58 = vmul.f32 %v924_v47, %v1828_v8  ;;  %1473 = vtanh.f32 %v875_v56  ;;  %v830_v54 = vadd.f32 %v798_v48, %v670_v11  ;;  %v745_v59 = vmul.f32 0.044715, %v681_v46 }
 0x17b   : > { %v1462_v61 = vpop.eup %1461  ;;  %1475 = vtanh.f32 %v869_v1  ;;  %v812_v63 = vmul.f32 %v780_v55, %v684_v15  ;;  %v1874_v0 = vmul.f32 0.5, %v674_v49  ;;  %v738_v3 = vmul.f32 0.044715, %v674_v49 }
 0x17c   : > { %v1464_v5 = vpop.eup %1463  ;;  %v932_v6 = vadd.f32 1.0, %v1462_v61  ;;  %v862_v2 = vmul.f32 0.7978846, %v830_v54  ;;  %v777_v7 = vmul.f32 %v745_v59, %v681_v46  ;;  %v688_v9 = vadd.f32 %v620_v50, %v1814_v44  ;;  %v605_v12 = vpop.permute.xlu1 %604 }
 0x17d   : > { %v571_v13 = vpop.permute.xlu0 %570  ;;  %v931_v14 = vadd.f32 1.0, %v1464_v5  ;;  %v844_v8 = vadd.f32 %v812_v63, %v684_v15  ;;  %v770_v16 = vmul.f32 %v738_v3, %v674_v49  ;;  %v687_v11 = vadd.f32 %v616_v51, %v1808_v38 }
 0x17e   : > { %v1466_v17 = vpop.eup %1465  ;;  %v1879_v18 = vmul.f32 %v932_v6, %v1830_v10  ;;  %1477 = vtanh.f32 %v862_v2  ;;  %v809_v19 = vmul.f32 %v777_v7, %v681_v46  ;;  %v1881_v21 = vmul.f32 0.5, %v688_v9 }
 0x17f   : > { %v1468_v24 = vpop.eup %1467  ;;  %v1884_v25 = vmul.f32 %v931_v14, %v1834_v22  ;;  %v929_v26 = vadd.f32 1.0, %v1466_v17  ;;  %v876_v27 = vmul.f32 0.7978846, %v844_v8  ;;  %v802_v28 = vmul.f32 %v770_v16, %v674_v49 }
 0x180   : > { %v925_v30 = vadd.f32 1.0, %v1468_v24  ;;  %v841_v15 = vadd.f32 %v809_v19, %v681_v46  ;;  %v752_v32 = vmul.f32 0.044715, %v688_v9  ;;  %v1886_v34 = vmul.f32 0.5, %v687_v11  ;;  %v639_v35 = vpop.permute.xlu1 %638 }
 0x181   : > { %v1889_v10 = vmul.f32 %v929_v26, %v1836_v23  ;;  %1479 = vtanh.f32 %v876_v27  ;;  %v834_v36 = vadd.f32 %v802_v28, %v674_v49  ;;  %v751_v40 = vmul.f32 0.044715, %v687_v11  ;;  %v635_v43 = vpop.permute.xlu0 %634 }
 0x182   : > { %v1470_v45 = vpop.eup %1469  ;;  %v1892_v22 = vmul.f32 %v925_v30, %v1840_v41  ;;  %v873_v47 = vmul.f32 0.7978846, %v841_v15  ;;  %v784_v56 = vmul.f32 %v752_v32, %v688_v9  ;;  %v685_v48 = vadd.f32 %v1789_v37, %v605_v12 }
 0x183   : > { %v1472_v46 = vpop.eup %1471  ;;  %v936_v50 = vadd.f32 1.0, %v1470_v45  ;;  %v866_v51 = vmul.f32 0.7978846, %v834_v36  ;;  %v783_v1 = vmul.f32 %v751_v40, %v687_v11  ;;  %v678_v55 = vadd.f32 %v1810_v39, %v571_v13 }
 0x184   : > { %v935_v23 = vadd.f32 1.0, %v1472_v46  ;;  %1481 = vtanh.f32 %v873_v47  ;;  %v816_v54 = vmul.f32 %v784_v56, %v688_v9  ;;  %v1896_v49 = vmul.f32 0.5, %v685_v48  ;;  %v624_v59 = vpop.permute.xlu1 %623 }
 0x185   : > { %v1899_v61 = vmul.f32 %v936_v50, %v1842_v42  ;;  %1483 = vtanh.f32 %v866_v51  ;;  %v815_v41 = vmul.f32 %v783_v1, %v687_v11  ;;  %v749_v63 = vmul.f32 0.044715, %v685_v48  ;;  %v590_v16 = vpop.permute.xlu0 %589 }
 0x186   : > { %v1902_v3 = vmul.f32 %v935_v23, %v1846_v57  ;;  %v848_v5 = vadd.f32 %v816_v54, %v688_v9  ;;  %v1904_v6 = vmul.f32 0.5, %v678_v55  ;;  %v742_v2 = vmul.f32 0.044715, %v678_v55 }
 0x187   : > { %v1474_v7 = vpop.eup %1473  ;;  %v847_v12 = vadd.f32 %v815_v41, %v687_v11  ;;  %v781_v13 = vmul.f32 %v749_v63, %v685_v48  ;;  %v692_v14 = vadd.f32 %v639_v35, %v1814_v44  ;;  %v691_v8 = vadd.f32 %v635_v43, %v1808_v38 }
 0x188   : > { %v1476_v42 = vpop.eup %1475  ;;  %v939_v17 = vadd.f32 1.0, %v1474_v7  ;;  %v880_v19 = vmul.f32 0.7978846, %v848_v5  ;;  %v774_v24 = vmul.f32 %v742_v2, %v678_v55  ;;  %v689_v26 = vadd.f32 %v1789_v37, %v624_v59  ;;  %v658_v57 = vpop.permute.xlu1 %657 }
 0x189   : > { %v933_v27 = vadd.f32 1.0, %v1476_v42  ;;  %v879_v9 = vmul.f32 0.7978846, %v847_v12  ;;  %v813_v28 = vmul.f32 %v781_v13, %v685_v48  ;;  %v1909_v30 = vmul.f32 0.5, %v692_v14  ;;  %v654_v23 = vpop.permute.xlu0 %653 }
 0x18a   : > { %v1912_v11 = vmul.f32 %v939_v17, %v1848_v62  ;;  %1485 = vtanh.f32 %v880_v19  ;;  %v806_v15 = vmul.f32 %v774_v24, %v678_v55  ;;  %v756_v32 = vmul.f32 0.044715, %v692_v14 }
 0x18b   : > { %v1478_v35 = vpop.eup %1477  ;;  %v1915_v36 = vmul.f32 %v933_v27, %v1850_v4  ;;  %1487 = vtanh.f32 %v879_v9  ;;  %v845_v40 = vadd.f32 %v813_v28, %v685_v48  ;;  %v1917_v43 = vmul.f32 0.5, %v691_v8 }
 0x18c   : > { %v926_v45 = vadd.f32 1.0, %v1478_v35  ;;  %v838_v47 = vadd.f32 %v806_v15, %v678_v55  ;;  %v788_v56 = vmul.f32 %v756_v32, %v692_v14  ;;  %v755_v46 = vmul.f32 0.044715, %v691_v8  ;;  %v643_v63 = vpop.permute.xlu1 %642 }
 0x18d   : > { %v877_v50 = vmul.f32 0.7978846, %v845_v40  ;;  %v1919_v51 = vmul.f32 0.5, %v689_v26  ;;  %v753_v62 = vmul.f32 0.044715, %v689_v26  ;;  %v682_v1 = vadd.f32 %v1810_v39, %v590_v16 }
 0x18e   : > { %v1480_v54 = vpop.eup %1479  ;;  %v1923_v59 = vmul.f32 %v926_v45, %v1854_v20  ;;  %v870_v4 = vmul.f32 0.7978846, %v838_v47  ;;  %v820_v41 = vmul.f32 %v788_v56, %v692_v14  ;;  %v787_v48 = vmul.f32 %v755_v46, %v691_v8  ;;  %v609_v45 = vpop.permute.xlu0 %608 }
 0x18f   : > { %v940_v5 = vadd.f32 1.0, %v1480_v54  ;;  %1489 = vtanh.f32 %v877_v50  ;;  %v785_v55 = vmul.f32 %v753_v62, %v689_v26  ;;  %v1925_v2 = vmul.f32 0.5, %v682_v1 }
 0x190   : > { %1491 = vtanh.f32 %v870_v4  ;;  %v852_v7 = vadd.f32 %v820_v41, %v692_v14  ;;  %v819_v12 = vmul.f32 %v787_v48, %v691_v8  ;;  %v746_v13 = vmul.f32 0.044715, %v682_v1 }
 0x191   : > { %v1482_v42 = vpop.eup %1481  ;;  %v1928_v16 = vmul.f32 %v940_v5, %v1859_v31  ;;  %v817_v17 = vmul.f32 %v785_v55, %v689_v26  ;;  %v696_v20 = vadd.f32 %v658_v57, %v1814_v44  ;;  %v695_v19 = vadd.f32 %v654_v23, %v1808_v38  ;;  %v662_v44 = vpop.permute.xlu1 %661 }
 0x192   : > { %v1484_v24 = vpop.eup %1483  ;;  %v937_v27 = vadd.f32 1.0, %v1482_v42  ;;  %v884_v9 = vmul.f32 0.7978846, %v852_v7  ;;  %v851_v28 = vadd.f32 %v819_v12, %v691_v8  ;;  %v778_v15 = vmul.f32 %v746_v13, %v682_v1  ;;  %v628_v42 = vpop.permute.xlu0 %627 }
 0x193   : > { %v930_v32 = vadd.f32 1.0, %v1484_v24  ;;  %v849_v35 = vadd.f32 %v817_v17, %v689_v26  ;;  %v1932_v40 = vmul.f32 0.5, %v696_v20  ;;  %v760_v14 = vmul.f32 0.044715, %v696_v20 }
 0x194   : > { %v1935_v47 = vmul.f32 %v937_v27, %v1869_v53  ;;  %1493 = vtanh.f32 %v884_v9  ;;  %v883_v31 = vmul.f32 0.7978846, %v851_v28  ;;  %v810_v56 = vmul.f32 %v778_v15, %v682_v1 }
 0x195   : > { %v1938_v38 = vmul.f32 %v930_v32, %v1874_v0  ;;  %v881_v57 = vmul.f32 0.7978846, %v849_v35  ;;  %v792_v46 = vmul.f32 %v760_v14, %v696_v20  ;;  %v1940_v8 = vmul.f32 0.5, %v695_v19  ;;  %v666_v27 = vpop.permute.xlu1 %665 }
 0x196   : > { %1495 = vtanh.f32 %v883_v31  ;;  %v842_v26 = vadd.f32 %v810_v56, %v682_v1  ;;  %v759_v50 = vmul.f32 0.044715, %v695_v19  ;;  %v693_v62 = vadd.f32 %v1789_v37, %v643_v63 }
 0x197   : > { %v1486_v23 = vpop.eup %1485  ;;  %1497 = vtanh.f32 %v881_v57  ;;  %v824_v53 = vmul.f32 %v792_v46, %v696_v20  ;;  %v686_v54 = vadd.f32 %v1810_v39, %v609_v45  ;;  %v697_v4 = vadd.f32 %v1789_v37, %v662_v44 }
 0x198   : > { %v1488_v41 = vpop.eup %1487  ;;  %v944_v48 = vadd.f32 1.0, %v1486_v23  ;;  %v874_v0 = vmul.f32 0.7978846, %v842_v26  ;;  %v791_v5 = vmul.f32 %v759_v50, %v695_v19  ;;  %v1945_v55 = vmul.f32 0.5, %v693_v62 }
 0x199   : > { %v943_v7 = vadd.f32 1.0, %v1488_v41  ;;  %v856_v12 = vadd.f32 %v824_v53, %v696_v20  ;;  %v757_v13 = vmul.f32 0.044715, %v693_v62  ;;  %v1947_v1 = vmul.f32 0.5, %v686_v54  ;;  %v647_v41 = vpop.permute.xlu0 %646 }
 0x19a   : > { %v1950_v63 = vmul.f32 %v944_v48, %v1881_v21  ;;  %1499 = vtanh.f32 %v874_v0  ;;  %v823_v17 = vmul.f32 %v791_v5, %v695_v19  ;;  %v750_v24 = vmul.f32 0.044715, %v686_v54 }
 0x19b   : > { %v1953_v37 = vmul.f32 %v943_v7, %v1886_v34  ;;  %v888_v9 = vmul.f32 0.7978846, %v856_v12  ;;  %v789_v28 = vmul.f32 %v757_v13, %v693_v62  ;;  %v1955_v15 = vmul.f32 0.5, %v697_v4 }
 0x19c   : > { %v1490_v32 = vpop.eup %1489  ;;  %v855_v20 = vadd.f32 %v823_v17, %v695_v19  ;;  %v782_v35 = vmul.f32 %v750_v24, %v686_v54  ;;  %v761_v14 = vmul.f32 0.044715, %v697_v4  ;;  %v690_v45 = vadd.f32 %v1810_v39, %v628_v42 }
 0x19d   : > { %v1492_v31 = vpop.eup %1491  ;;  %v941_v21 = vadd.f32 1.0, %v1490_v32  ;;  %1501 = vtanh.f32 %v888_v9  ;;  %v821_v56 = vmul.f32 %v789_v28, %v693_v62  ;;  %v698_v44 = vadd.f32 %v1810_v39, %v666_v27 }
 0x19e   : > { %v934_v57 = vadd.f32 1.0, %v1492_v31  ;;  %v887_v46 = vmul.f32 0.7978846, %v855_v20  ;;  %v814_v34 = vmul.f32 %v782_v35, %v686_v54  ;;  %v793_v26 = vmul.f32 %v761_v14, %v697_v4 }
 0x19f   : > { %v1960_v50 = vmul.f32 %v941_v21, %v1896_v49  ;;  %v853_v23 = vadd.f32 %v821_v56, %v693_v62  ;;  %v1962_v53 = vmul.f32 0.5, %v690_v45  ;;  %v754_v19 = vmul.f32 0.044715, %v690_v45 }
 0x1a0   : > { %v1965_v48 = vmul.f32 %v934_v57, %v1904_v6  ;;  %1503 = vtanh.f32 %v887_v46  ;;  %v846_v0 = vadd.f32 %v814_v34, %v686_v54  ;;  %v825_v5 = vmul.f32 %v793_v26, %v697_v4 }
 0x1a1   : > { %v1494_v7 = vpop.eup %1493  ;;  %v885_v12 = vmul.f32 0.7978846, %v853_v23  ;;  %v786_v13 = vmul.f32 %v754_v19, %v690_v45  ;;  %v1967_v42 = vmul.f32 0.5, %v698_v44  ;;  %v762_v17 = vmul.f32 0.044715, %v698_v44  ;;  %v999_v24 = vpop.permute.xlu1 %998 }
 0x1a2   : > { %v948_v49 = vadd.f32 1.0, %v1494_v7  ;;  %v878_v27 = vmul.f32 0.7978846, %v846_v0  ;;  %v857_v62 = vadd.f32 %v825_v5, %v697_v4  ;;  %v694_v9 = vadd.f32 %v1810_v39, %v647_v41  ;;  %v994_v41 = vpop.permute.xlu0 %993 }
 0x1a3   : > { %v1496_v28 = vpop.eup %1495  ;;  %1505 = vtanh.f32 %v885_v12  ;;  %v818_v6 = vmul.f32 %v786_v13, %v690_v45  ;;  %v794_v32 = vmul.f32 %v762_v17, %v698_v44  ;;  %v1971_v54 = vmul.f32 %v999_v24, %v1872_v58 }
 0x1a4   : > { %v1498_v20 = vpop.eup %1497  ;;  %v980_v35 = vmul.f32 %v948_v49, %v1909_v30  ;;  %v947_v14 = vadd.f32 1.0, %v1496_v28  ;;  %1507 = vtanh.f32 %v878_v27  ;;  %v889_v31 = vmul.f32 0.7978846, %v857_v62 }
 0x1a5   : > { %v945_v21 = vadd.f32 1.0, %v1498_v20  ;;  %v850_v56 = vadd.f32 %v818_v6, %v690_v45  ;;  %v826_v57 = vmul.f32 %v794_v32, %v698_v44  ;;  %v1974_v4 = vmul.f32 0.5, %v694_v9 }
 0x1a6   : > { %v979_v39 = vmul.f32 %v947_v14, %v1917_v43  ;;  %1509 = vtanh.f32 %v889_v31  ;;  %v758_v46 = vmul.f32 0.044715, %v694_v9  ;;  %v1016_v34 = vmul.f32 %v999_v24, %v1867_v52 }
 0x1a7   : > { %v1500_v26 = vpop.eup %1499  ;;  %v977_v58 = vmul.f32 %v945_v21, %v1919_v51  ;;  %v882_v23 = vmul.f32 0.7978846, %v850_v56  ;;  %v858_v19 = vadd.f32 %v826_v57, %v698_v44  ;;  %v1020_v30 = vmul.f32 %v999_v24, %v1879_v18 }
 0x1a8   : > { %v938_v0 = vadd.f32 1.0, %v1500_v26  ;;  %v790_v5 = vmul.f32 %v758_v46, %v694_v9  ;;  %v1024_v45 = vmul.f32 %v999_v24, %v1899_v61  ;;  %v1982_v7 = vmul.f32 %v999_v24, %v1928_v16 }
 0x1a9   : > { %1511 = vtanh.f32 %v882_v23  ;;  %v890_v43 = vmul.f32 0.7978846, %v858_v19  ;;  %v1032_v12 = vmul.f32 %v999_v24, %v1950_v63  ;;  %v1036_v52 = vmul.f32 %v999_v24, %v980_v35 }
 0x1aa   : > { %v1502_v13 = vpop.eup %1501  ;;  %v1986_v51 = vmul.f32 %v938_v0, %v1925_v2  ;;  %v822_v44 = vmul.f32 %v790_v5, %v694_v9  ;;  %v1011_v18 = vmul.f32 %v994_v41, %v1862_v33  ;;  %v1015_v17 = vmul.f32 %v994_v41, %v1857_v29  ;;  %v1004_v2 = vpop.permute.xlu1 %1003 }
 0x1ab   : > { %v952_v49 = vadd.f32 1.0, %v1502_v13  ;;  %1513 = vtanh.f32 %v890_v43  ;;  %v1019_v61 = vmul.f32 %v994_v41, %v1884_v25  ;;  %v1023_v16 = vmul.f32 %v994_v41, %v1902_v3 }
 0x1ac   : > { %v854_v27 = vadd.f32 %v822_v44, %v694_v9  ;;  %v1027_v62 = vmul.f32 %v994_v41, %v1912_v11  ;;  %v1031_v63 = vmul.f32 %v994_v41, %v1953_v37  ;;  %v1994_v28 = vmul.f32 %v994_v41, %v979_v39 }
 0x1ad   : > { %v1504_v6 = vpop.eup %1503  ;;  %v984_v32 = vmul.f32 %v952_v49, %v1932_v40  ;;  %v1058_v33 = vsel %vm1043_vm2, %v1016_v34, 0.0  ;;  %v1071_v29 = vsel %vm1043_vm2, %v1020_v30, 0.0  ;;  %v1084_v20 = vsel %vm1043_vm2, %v1024_v45, 0.0 }
 0x1ae   : > { %v951_v25 = vadd.f32 1.0, %v1504_v6  ;;  %v886_v35 = vmul.f32 0.7978846, %v854_v27  ;;  %v1110_v3 = vsel %vm1043_vm2, %v1032_v12, 0.0  ;;  %v1123_v11 = vsel %vm1043_vm2, %v1036_v52, 0.0 }
 0x1af   : > { %v1040_v9 = vmul.f32 %v999_v24, %v984_v32  ;;  %v1013_v37 = vmul.f32 %v1004_v2, %v1892_v22  ;;  %v1017_v14 = vmul.f32 %v1004_v2, %v1889_v10  ;;  %v1021_v31 = vmul.f32 %v1004_v2, %v1915_v36 }
 0x1b0   : > { %v1506_v40 = vpop.eup %1505  ;;  %v983_v21 = vmul.f32 %v951_v25, %v1940_v8  ;;  %1515 = vtanh.f32 %v886_v35  ;;  %v1025_v56 = vmul.f32 %v1004_v2, %v1935_v47  ;;  %v1029_v57 = vmul.f32 %v1004_v2, %v1960_v50 }
 0x1b1   : > { %v1508_v39 = vpop.eup %1507  ;;  %v949_v46 = vadd.f32 1.0, %v1506_v40  ;;  %v1136_v34 = vsel %vm1043_vm2, %v1040_v9, 0.0  ;;  %v1033_v26 = vmul.f32 %v1004_v2, %v977_v58  ;;  %v1044_v24 = vsel %vm1043_vm2, %v1011_v18, 0.0  ;;  %v1009_v9 = vpop.permute.xlu0 %1008 }
 0x1b2   : > { %v942_v22 = vadd.f32 1.0, %v1508_v39  ;;  %v1039_v23 = vmul.f32 %v994_v41, %v983_v21  ;;  %v1045_v10 = vsel %vm1043_vm2, %v1971_v54, 0.0  ;;  %v1047_v36 = vsel %vm1043_vm2, %v1013_v37, 0.0 }
 0x1b3   : > { %v1510_v8 = vpop.eup %1509  ;;  %v981_v19 = vmul.f32 %v949_v46, %v1945_v55  ;;  %v1046_v47 = vadd.f32 %v1045_v10, %v1044_v24  ;;  %v1057_v50 = vsel %vm1043_vm2, %v1015_v17, 0.0  ;;  %v1060_v30 = vsel %vm1043_vm2, %v1017_v14, 0.0 }
 0x1b4   : > { %v974_v0 = vmul.f32 %v942_v22, %v1947_v1  ;;  %v953_v58 = vadd.f32 1.0, %v1510_v8  ;;  %v1059_v5 = vadd.f32 %v1058_v33, %v1057_v50  ;;  %v1070_v45 = vsel %vm1043_vm2, %v1019_v61, 0.0 }
 0x1b5   : > { %v1037_v41 = vmul.f32 %v1004_v2, %v981_v19  ;;  %v1048_v43 = vadd.f32 %v1047_v36, %v1046_v47  ;;  %v1072_v12 = vadd.f32 %v1071_v29, %v1070_v45  ;;  %v1073_v54 = vsel %vm1043_vm2, %v1021_v31, 0.0 }
 0x1b6   : > { %v1512_v52 = vpop.eup %1511  ;;  %v985_v13 = vmul.f32 %v953_v58, %v1955_v15  ;;  %v1061_v55 = vadd.f32 %v1060_v30, %v1059_v5  ;;  %v1083_v44 = vsel %vm1043_vm2, %v1023_v16, 0.0  ;;  %v1086_v18 = vsel %vm1043_vm2, %v1025_v56, 0.0 }
 0x1b7   : > { %v946_v17 = vadd.f32 1.0, %v1512_v52  ;;  %v1074_v49 = vadd.f32 %v1073_v54, %v1072_v12  ;;  %v1085_v1 = vadd.f32 %v1084_v20, %v1083_v44  ;;  %v1096_v27 = vsel %vm1043_vm2, %v1027_v62, 0.0 }
 0x1b8   : > { %v1514_v6 = vpop.eup %1513  ;;  %v1041_v61 = vmul.f32 %v1004_v2, %v985_v13  ;;  %v1097_v32 = vsel %vm1043_vm2, %v1982_v7, 0.0  ;;  %v1099_v33 = vsel %vm1043_vm2, %v1029_v57, 0.0  ;;  %v1109_v29 = vsel %vm1043_vm2, %v1031_v63, 0.0 }
 0x1b9   : > { %v978_v15 = vmul.f32 %v946_v17, %v1962_v53  ;;  %v954_v25 = vadd.f32 1.0, %v1514_v6  ;;  %v1087_v16 = vadd.f32 %v1086_v18, %v1085_v1  ;;  %v1098_v35 = vadd.f32 %v1097_v32, %v1096_v27 }
 0x1ba   : > { %v1111_v37 = vadd.f32 %v1110_v3, %v1109_v29  ;;  %v1112_v20 = vsel %vm1043_vm2, %v1033_v26, 0.0  ;;  %v1122_v62 = vsel %vm1043_vm2, %v1994_v28, 0.0  ;;  %v1125_v2 = vsel %vm1043_vm2, %v1037_v41, 0.0 }
 0x1bb   : > { %v986_v7 = vmul.f32 %v954_v25, %v1967_v42  ;;  %v1100_v14 = vadd.f32 %v1099_v33, %v1098_v35  ;;  %v1124_v31 = vadd.f32 %v1123_v11, %v1122_v62  ;;  %v1135_v63 = vsel %vm1043_vm2, %v1039_v23, 0.0 }
 0x1bc   : > { %v1113_v40 = vadd.f32 %v1112_v20, %v1111_v37  ;;  %v1137_v53 = vadd.f32 %v1136_v34, %v1135_v63  ;;  %v1138_v21 = vsel %vm1043_vm2, %v1041_v61, 0.0  ;;  %v1014_v56 = vmul.f32 %v1009_v9, %v1923_v59 }
 0x1bd   : > { %v1516_v3 = vpop.eup %1515  ;;  %v1126_v57 = vadd.f32 %v1125_v2, %v1124_v31  ;;  %v1018_v39 = vmul.f32 %v1009_v9, %v1938_v38  ;;  %v1022_v28 = vmul.f32 %v1009_v9, %v1965_v48  ;;  %v1026_v46 = vmul.f32 %v1009_v9, %v1986_v51 }
 0x1be   : > { %v950_v26 = vadd.f32 1.0, %v1516_v3  ;;  %v1139_v42 = vadd.f32 %v1138_v21, %v1137_v53  ;;  %v1030_v24 = vmul.f32 %v1009_v9, %v974_v0  ;;  %v1034_v11 = vmul.f32 %v1009_v9, %v978_v15 }
 0x1bf   : > { %v1042_v22 = vmul.f32 %v1009_v9, %v986_v7  ;;  %v1049_v23 = vsel %vm1043_vm2, %v1014_v56, 0.0  ;;  %v1062_v34 = vsel %vm1043_vm2, %v1018_v39, 0.0  ;;  %v1075_v10 = vsel %vm1043_vm2, %v1022_v28, 0.0 }
 0x1c0   : > { %v982_v59 = vmul.f32 %v950_v26, %v1974_v4  ;;  %v1050_v36 = vadd.f32 %v1049_v23, %v1048_v43  ;;  %v1063_v8 = vadd.f32 %v1062_v34, %v1061_v55  ;;  %v1076_v38 = vadd.f32 %v1075_v10, %v1074_v49 }
 0x1c1   : > { %v1088_v48 = vsel %vm1043_vm2, %v1026_v46, 0.0  ;;  %v1101_v51 = vsel %vm1043_vm2, %v1030_v24, 0.0  ;;  %v1114_v19 = vsel %vm1043_vm2, %v1034_v11, 0.0  ;;  %v1140_v47 = vsel %vm1043_vm2, %v1042_v22, 0.0 }
 0x1c2   : > { %v1038_v50 = vmul.f32 %v1009_v9, %v982_v59  ;;  %v1051_v30 = vrot.slane %v1050_v36, 4  ;;  %v1064_v0 = vrot.slane %v1063_v8, 4  ;;  %v1077_v58 = vrot.slane %v1076_v38, 4 }
 0x1c3   : > { %v1089_v5 = vadd.f32 %v1088_v48, %v1087_v16  ;;  %v1102_v45 = vadd.f32 %v1101_v51, %v1100_v14  ;;  %v1115_v41 = vadd.f32 %v1114_v19, %v1113_v40  ;;  %v1141_v12 = vadd.f32 %v1140_v47, %v1139_v42 }
 0x1c4   : > { %v1052_v4 = vadd.f32 %v1051_v30, %v1050_v36  ;;  %v1065_v43 = vadd.f32 %v1064_v0, %v1063_v8  ;;  %v1078_v54 = vadd.f32 %v1077_v58, %v1076_v38  ;;  %v1127_v52 = vsel %vm1043_vm2, %v1038_v50, 0.0 }
 0x1c5   : > { %v1090_v13 = vrot.slane %v1089_v5, 4  ;;  %v1103_v55 = vrot.slane %v1102_v45, 4  ;;  %v1116_v44 = vrot.slane %v1115_v41, 4  ;;  %v1128_v18 = vadd.f32 %v1127_v52, %v1126_v57 }
 0x1c6   : > { %v1053_v17 = vrot.slane %v1052_v4, 2  ;;  %v1066_v49 = vrot.slane %v1065_v43, 2  ;;  %v1079_v1 = vrot.slane %v1078_v54, 2  ;;  %v1142_v27 = vrot.slane %v1141_v12, 4 }
 0x1c7   : > { %v1091_v6 = vadd.f32 %v1090_v13, %v1089_v5  ;;  %v1104_v61 = vadd.f32 %v1103_v55, %v1102_v45  ;;  %v1117_v32 = vadd.f32 %v1116_v44, %v1115_v41  ;;  %v1129_v33 = vrot.slane %v1128_v18, 4 }
 0x1c8   : > { %v1054_v29 = vadd.f32 %v1053_v17, %v1052_v4  ;;  %v1067_v15 = vadd.f32 %v1066_v49, %v1065_v43  ;;  %v1080_v25 = vadd.f32 %v1079_v1, %v1078_v54  ;;  %v1143_v16 = vadd.f32 %v1142_v27, %v1141_v12 }
 0x1c9   : > { %v1092_v35 = vrot.slane %v1091_v6, 2  ;;  %v1105_v9 = vrot.slane %v1104_v61, 2  ;;  %v1118_v37 = vrot.slane %v1117_v32, 2  ;;  %v1130_v20 = vadd.f32 %v1129_v33, %v1128_v18 }
 0x1ca   : > { %v1055_v62 = vrot.slane %v1054_v29, 1  ;;  %v1068_v2 = vrot.slane %v1067_v15, 1  ;;  %v1081_v7 = vrot.slane %v1080_v25, 1  ;;  %v1144_v14 = vrot.slane %v1143_v16, 2 }
 0x1cb   : > { %v1093_v31 = vadd.f32 %v1092_v35, %v1091_v6  ;;  %v1106_v63 = vadd.f32 %v1105_v9, %v1104_v61  ;;  %v1119_v40 = vadd.f32 %v1118_v37, %v1117_v32  ;;  %v1131_v53 = vrot.slane %v1130_v20, 2 }
 0x1cc   : > { %v1056_v21 = vadd.f32 %v1055_v62, %v1054_v29  ;;  %v1069_v56 = vadd.f32 %v1068_v2, %v1067_v15  ;;  %v1082_v3 = vadd.f32 %v1081_v7, %v1080_v25  ;;  %v1145_v57 = vadd.f32 %v1144_v14, %v1143_v16 }
 0x1cd   : > { %v1094_v39 = vrot.slane %v1093_v31, 1  ;;  %v1107_v28 = vrot.slane %v1106_v63, 1  ;;  %v1120_v46 = vrot.slane %v1119_v40, 1  ;;  %v1132_v26 = vadd.f32 %v1131_v53, %v1130_v20 }
 0x1ce   : > { %v1146_v42 = vrot.slane %v1145_v57, 1  ;;  %v1150_v24 = vadd.f32 %v1820_v60, %v1056_v21  ;;  %v1151_v11 = vadd.f32 %v1820_v60, %v1069_v56  ;;  %v1152_v22 = vadd.f32 %v1820_v60, %v1082_v3 }
 0x1cf   : > { %v1095_v23 = vadd.f32 %v1094_v39, %v1093_v31  ;;  %v1108_v34 = vadd.f32 %v1107_v28, %v1106_v63  ;;  %v1121_v10 = vadd.f32 %v1120_v46, %v1119_v40  ;;  %v1133_v59 = vrot.slane %v1132_v26, 1 }
 0x1d0   : > { %v1147_v36 = vadd.f32 %v1146_v42, %v1145_v57  ;;  %v1167_v8 = vsel %vm1166_vm3, %v1151_v11, %v1150_v24 }
 0x1d1   : > { %v1134_v38 = vadd.f32 %v1133_v59, %v1132_v26  ;;  %v1153_v48 = vadd.f32 %v1820_v60, %v1095_v23  ;;  %v1154_v51 = vadd.f32 %v1820_v60, %v1108_v34  ;;  %v1155_v19 = vadd.f32 %v1820_v60, %v1121_v10 }
 0x1d2   : > { %v1169_v47 = vsel %vm1168_vm4, %v1152_v22, %v1167_v8  ;;  %v1157_v30 = vadd.f32 %v1820_v60, %v1147_v36 }
 0x1d3   : > { %v1156_v50 = vadd.f32 %v1820_v60, %v1134_v38  ;;  %v1171_v0 = vsel %vm1170_vm5, %v1153_v48, %v1169_v47 }
 0x1d4   : > { %v1173_v58 = vsel %vm1172_vm6, %v1154_v51, %v1171_v0 }
 0x1d5   : > { %v1175_v5 = vsel %vm1174_vm7, %v1155_v19, %v1173_v58 }
 0x1d6   : > { %v1177_v45 = vsel %vm1176_vm8, %v1156_v50, %v1175_v5 }
 0x1d7   : > { %v1179_v41 = vsel %vm1178_vm9, %v1157_v30, %v1177_v45 }
 0x1d8   : > { %1181 = vst.msk [vmem:[%s347_s26] sm:$0xff] %vm1043_vm2, %v1179_v41 }
 0x1d9   : > { %1556 = shalt.err (!%p1553_p7)
}
 0x1da   : > { %s1557_s10 = scalar_lea.hbm %s2065_s23, 128  ;;  %s1561_s26 = scalar_lea.hbm %s2115_s8, 256 }
 0x1db   : > { %p1558_p9 = scmp.ne.s32.totalorder %s2065_s23, %s1557_s10  ;;  %p1562_p12 = scmp.lt.s32.totalorder %s2065_s23, %s2115_s8 }
 0x1dc   : > { %p1563_p13 = scmp.lt.s32.totalorder %s1561_s26, %s1557_s10 }
 0x1dd   : > { %p1559_p10 = pnand %p1558_p9, %p1718_p4 }
 0x1de   : > { %p1564_p0 = por %p1563_p13, %p1562_p12 }
 0x1df   : > { %p1560_p11 = pneg %p1559_p10 }
 0x1e1   : > { %p1565_p1 = pnand %p1564_p0, %p1560_p11 }
 0x1e3   : > { %1568 = shalt.err (!%p1565_p1)
}
 0x1e4   : > { %1383 = dma.vmem_to_hbm [thread:$0]  (%p1718_p4), %s1217_s13, 128, %s2065_s23, %s1188_s28  }
 0x1e5 PF: > { %p1393_p2 = scmp.ge.s32.totalorder %s1623_s12, 2  ;;  %s1228_s22 = sand.u32 1, %s1603_s29  }
 0x1e6   : > { %s1229_s27 = scalar_lea.sflag [#allocation4], %s1228_s22 }
 0x1e7   : > { %p1387_p3 = pnand %p1393_p2, %p1725_p8 }
 0x1e9   : > { %p1388_p5 = pneg %p1387_p3 }
 0x1eb   : > { %1594 = dma.done.wait (%p1388_p5), %s1229_s27, 128  }
 0x1ec   : > { %1596 = vsyncadd (%p1388_p5), %s1229_s27, 4294967168  ;;  %s1238_s6 = scalar_lea.sflag [#allocation6], %s1228_s22 }
 0x1ed   : > { %1598 = dma.done.wait (%p1388_p5), %s1238_s6, 128  }
 0x1ee   : > { %1600 = vsyncadd (%p1388_p5), %s1238_s6, 4294967168  ;;  %s26_s12 = sadd.s32 1, %s1623_s12   ;;  %s2122_s29 = smov %s1607_s30 }
 0x1ef   : > { %p23_p6 = scmp.ge.s32.totalorder %s26_s12, 4   ;;  %s2123_s30 = smov %s1611_s9 }
 0x1f0   : > { %s2124_s9 = smov %s1731_s19  ;;  %s2125_s10 = smov %s1619_s11 }
 0x1f1   : > { %s2126_s11 = smov %s2128_s14  ;;  %25 = sbr.rel (!%p23_p6) target bundleno = 8 (0x8), region = 103 }
 0x1f6   :  { %1243 = vsyncpa [#allocation4], 1 }
 0x1f7   :  { %1245 = vsyncpa [#allocation4 + $0x1], 1 }
 0x1f8   :  { %1246 = vsyncpa [#allocation6], 1 }
 0x1f9   :  { %1248 = vsyncpa [#allocation6 + $0x1], 1 }

</bundles_post_ra>
